<compile_context>
chip_gen: v6e
topology: v6e:2x2x1
jax: 0.10.0
libtpu: 0.0.40
codegen_flags: <defaults>
</compile_context>

<pallas_src>
import jax
import jax.numpy as jnp
from jax.experimental import pallas as pl
from jax.experimental.pallas import tpu as pltpu

# ---- "config" (synthetic, deterministic) -------------------------------------
NUM_TICKERS = 4          # s_dim = a_dim = num_tickers
S_DIM = NUM_TICKERS
A_DIM = NUM_TICKERS
Z_DIM = A_DIM * 2
HIDDEN = 128
ACTION_SCALE = 1.0
OUT_W = A_DIM + 2 * Z_DIM          # packed output width: [a | mean | std]

BATCH = 32
TILE_B = 16                        # bf16 sublane-packed batch tile


def _dot(x, w):
    # bf16 operands, f32 accumulation on the MXU.
    return jnp.dot(x, w, preferred_element_type=jnp.float32)


def vae_kernel(scale_ref,
               # per-tile inputs
               state_ref, action_ref, eps_ref,
               # resident weights / biases
               sw_ref,                 # fused [S_DIM, 2*HIDDEN]: [e1_state | d1_state]
               e1wa_ref, e1b_ref,
               e2w_ref, e2b_ref,
               mlw_ref, mlb_ref,
               d1wz_ref, d1b_ref,
               d2w_ref, d2b_ref,
               d3w_ref, d3b_ref,
               # packed output
               out_ref):
    state = state_ref[...]          # bf16 [tb, S]
    action = action_ref[...]        # bf16 [tb, A]

    # Fused state projection for BOTH e1 and d1 state-halves (single MXU push),
    # sliced at the lane-128 boundary -> no VMEM copy.
    sp = _dot(state, sw_ref[...])                                            # f32 [tb, 2H]

    # ---------------- encoder (concat removed via split weights) ----------------
    h = sp[:, :HIDDEN] + _dot(action, e1wa_ref[...]) + e1b_ref[...]
    h = jnp.maximum(h, 0.0)                                                  # f32 [tb, H]
    h = jnp.maximum(_dot(h.astype(jnp.bfloat16), e2w_ref[...]) + e2b_ref[...], 0.0)

    # fused mean / log_std projection (single narrow matmul, sliced after)
    ml = _dot(h.astype(jnp.bfloat16), mlw_ref[...]) + mlb_ref[...]           # f32 [tb, 2z]
    mean = ml[:, :Z_DIM]
    log_std = jnp.clip(ml[:, Z_DIM:], -4.0, 15.0)
    std = jnp.exp(log_std)                                                   # f32, std > 0
    z = mean + std * eps_ref[...]                                            # reparam, f32

    # ---------------- decoder (concat removed via split weights) ----------------
    hd = sp[:, HIDDEN:] + _dot(z.astype(jnp.bfloat16), d1wz_ref[...]) + d1b_ref[...]
    hd = jnp.maximum(hd, 0.0)
    hd = jnp.maximum(_dot(hd.astype(jnp.bfloat16), d2w_ref[...]) + d2b_ref[...], 0.0)
    a = scale_ref[0, 0] * jnp.tanh(_dot(hd.astype(jnp.bfloat16), d3w_ref[...]) + d3b_ref[...])

    # single lane-packed output store: [a | mean | std]
    out_ref[...] = jnp.concatenate([a, mean, std], axis=1)


def vae_forward(state, action, eps, params, action_scale=ACTION_SCALE, tile_b=TILE_B):
    """state: [B, s_dim], action: [B, a_dim], eps: [B, z_dim] (randn noise)."""
    batch = state.shape[0]
    pad = (-batch) % tile_b
    if pad:
        state = jnp.pad(state, ((0, pad), (0, 0)))
        action = jnp.pad(action, ((0, pad), (0, 0)))
        eps = jnp.pad(eps, ((0, pad), (0, 0)))
    b_pad = batch + pad
    grid = (b_pad // tile_b,)

    state_bf = state.astype(jnp.bfloat16)
    action_bf = action.astype(jnp.bfloat16)
    eps_f32 = eps.astype(jnp.float32)
    scale = jnp.full((1, 1), action_scale, jnp.float32)

    def batch_spec(width):
        return pl.BlockSpec((tile_b, width), lambda b: (b, 0))

    def resident_spec(arr):
        # index_map ignores the batch axis -> weight DMA'd once, stays in VMEM.
        return pl.BlockSpec(arr.shape, lambda b: (0,) * arr.ndim)

    in_specs = (
        [pl.BlockSpec((1, 1), lambda b: (0, 0),
                      memory_space=pltpu.MemorySpace.SMEM),
         batch_spec(S_DIM), batch_spec(A_DIM), batch_spec(Z_DIM)]
        + [resident_spec(p) for p in params])

    packed = pl.pallas_call(
        vae_kernel,
        out_shape=jax.ShapeDtypeStruct((b_pad, OUT_W), jnp.float32),
        grid=grid,
        in_specs=in_specs,
        out_specs=pl.BlockSpec((tile_b, OUT_W), lambda b: (b, 0)),
        compiler_params=pltpu.CompilerParams(
            dimension_semantics=("parallel",)),   # shard batch tiles across TCs on v7x
    )(scale, state_bf, action_bf, eps_f32, *params)

    packed = packed[:batch]
    a = packed[:, :A_DIM]
    mean = packed[:, A_DIM:A_DIM + Z_DIM]
    std = packed[:, A_DIM + Z_DIM:]
    return a, mean, std


def init_params(key):
    """Deterministic synthetic init (uniform, PyTorch-Linear-like bounds), then
    reshaped into the kernel layout: split e1/d1, fused state projection,
    fused mu/log_std, bf16 weights."""
    def linear(key, fan_in, fan_out):
        kw, kb = jax.random.split(key)
        bound = 1.0 / jnp.sqrt(fan_in)
        w = jax.random.uniform(kw, (fan_in, fan_out), jnp.float32, -bound, bound)
        b = jax.random.uniform(kb, (1, fan_out), jnp.float32, -bound, bound)
        return w, b

    keys = jax.random.split(key, 7)
    e1w, e1b = linear(keys[0], S_DIM + A_DIM, HIDDEN)
    e2w, e2b = linear(keys[1], HIDDEN, HIDDEN)
    muw, mub = linear(keys[2], HIDDEN, Z_DIM)
    lsw, lsb = linear(keys[3], HIDDEN, Z_DIM)
    d1w, d1b = linear(keys[4], S_DIM + Z_DIM, HIDDEN)
    d2w, d2b = linear(keys[5], HIDDEN, HIDDEN)
    d3w, d3b = linear(keys[6], HIDDEN, A_DIM)

    bf = lambda w: w.astype(jnp.bfloat16)
    e1w_s, e1w_a = e1w[:S_DIM], e1w[S_DIM:]                    # split concat([s, a])
    d1w_s, d1w_z = d1w[:S_DIM], d1w[S_DIM:]                    # split concat([s, z])
    sw = bf(jnp.concatenate([e1w_s, d1w_s], axis=1))           # fuse e1/d1 state halves
    mlw = bf(jnp.concatenate([muw, lsw], axis=1))              # fuse mu | log_std
    mlb = jnp.concatenate([mub, lsb], axis=1)
    return (sw,
            bf(e1w_a), e1b,
            bf(e2w), e2b,
            mlw, mlb,
            bf(d1w_z), d1b,
            bf(d2w), d2b,
            bf(d3w), d3b)


def vae_reference(state, action, eps, params, action_scale=ACTION_SCALE):
    """Pure-JAX reference with the same bf16 weight / f32 accumulate path."""
    (sw, e1wa, e1b, e2w, e2b, mlw, mlb,
     d1wz, d1b, d2w, d2b, d3w, d3b) = params
    dot = lambda x, w: jnp.dot(x, w, preferred_element_type=jnp.float32)
    s = state.astype(jnp.bfloat16)
    a_in = action.astype(jnp.bfloat16)
    sp = dot(s, sw)
    h = jnp.maximum(sp[:, :HIDDEN] + dot(a_in, e1wa) + e1b, 0.0)
    h = jnp.maximum(dot(h.astype(jnp.bfloat16), e2w) + e2b, 0.0)
    ml = dot(h.astype(jnp.bfloat16), mlw) + mlb
    mean = ml[:, :Z_DIM]
    std = jnp.exp(jnp.clip(ml[:, Z_DIM:], -4.0, 15.0))
    z = mean + std * eps
    hd = jnp.maximum(sp[:, HIDDEN:] + dot(z.astype(jnp.bfloat16), d1wz) + d1b, 0.0)
    hd = jnp.maximum(dot(hd.astype(jnp.bfloat16), d2w) + d2b, 0.0)
    a = action_scale * jnp.tanh(dot(hd.astype(jnp.bfloat16), d3w) + d3b)
    return a, mean, std


if __name__ == "__main__":
    key = jax.random.PRNGKey(0)
    k_params, k_state, k_action, k_eps = jax.random.split(key, 4)

    params = init_params(k_params)
    state = jax.random.normal(k_state, (BATCH, S_DIM), jnp.float32)
    action = jax.random.normal(k_action, (BATCH, A_DIM), jnp.float32)
    # Reparameterization noise (torch.randn_like equivalent), generated host-side
    # for determinism and passed into the kernel.
    eps = jax.random.normal(k_eps, (BATCH, Z_DIM), jnp.float32)

    a_out, mean_out, std_out = jax.block_until_ready(
        vae_forward(state, action, eps, params))

    # Sanity: shapes / finiteness / positivity
    assert a_out.shape == (BATCH, A_DIM)
    assert mean_out.shape == (BATCH, Z_DIM)
    assert std_out.shape == (BATCH, Z_DIM)
    assert bool(jnp.all(jnp.isfinite(a_out)))
    assert bool(jnp.all(std_out > 0))

    # Numerical check vs pure-JAX reference (same bf16/f32 path)
    a_ref, mean_ref, std_ref = vae_reference(state, action, eps, params)
    assert bool(jnp.allclose(a_out, a_ref, atol=2e-2, rtol=2e-2))
    assert bool(jnp.allclose(mean_out, mean_ref, atol=2e-2, rtol=2e-2))
    assert bool(jnp.allclose(std_out, std_ref, atol=2e-2, rtol=2e-2))

    print("KERNEL_OK")
</pallas_src>

<mosaic_0001>
module attributes {stable_mosaic.version = 11 : i64} {
  func.func @vae_kernel(%arg0: i32, %arg1: memref<1x1xf32, #tpu.memory_space<smem>>, %arg2: memref<16x4xbf16, #tpu.memory_space<vmem>>, %arg3: memref<16x4xbf16, #tpu.memory_space<vmem>>, %arg4: memref<16x8xf32, #tpu.memory_space<vmem>>, %arg5: memref<4x256xbf16, #tpu.memory_space<vmem>>, %arg6: memref<4x128xbf16, #tpu.memory_space<vmem>>, %arg7: memref<1x128xf32, #tpu.memory_space<vmem>>, %arg8: memref<128x128xbf16, #tpu.memory_space<vmem>>, %arg9: memref<1x128xf32, #tpu.memory_space<vmem>>, %arg10: memref<128x16xbf16, #tpu.memory_space<vmem>>, %arg11: memref<1x16xf32, #tpu.memory_space<vmem>>, %arg12: memref<8x128xbf16, #tpu.memory_space<vmem>>, %arg13: memref<1x128xf32, #tpu.memory_space<vmem>>, %arg14: memref<128x128xbf16, #tpu.memory_space<vmem>>, %arg15: memref<1x128xf32, #tpu.memory_space<vmem>>, %arg16: memref<128x4xbf16, #tpu.memory_space<vmem>>, %arg17: memref<1x4xf32, #tpu.memory_space<vmem>>, %arg18: memref<16x20xf32, #tpu.memory_space<vmem>>) attributes {dimension_semantics = [#tpu.dimension_semantics<parallel>], iteration_bounds = array<i64: 2>, scalar_prefetch = 0 : i64, scratch_operands = 0 : i64, tpu.core_type = #tpu.core_type<tc>, window_params = [{transform_indices = @transform_0, window_bounds = array<i64: 1, 1>}, {transform_indices = @transform_1, window_bounds = array<i64: 16, 4>}, {transform_indices = @transform_2, window_bounds = array<i64: 16, 4>}, {transform_indices = @transform_3, window_bounds = array<i64: 16, 8>}, {pipeline_mode = #tpu.pipeline_mode<synchronous>, transform_indices = @transform_4, window_bounds = array<i64: 4, 256>}, {pipeline_mode = #tpu.pipeline_mode<synchronous>, transform_indices = @transform_5, window_bounds = array<i64: 4, 128>}, {pipeline_mode = #tpu.pipeline_mode<synchronous>, transform_indices = @transform_6, window_bounds = array<i64: 1, 128>}, {pipeline_mode = #tpu.pipeline_mode<synchronous>, transform_indices = @transform_7, window_bounds = array<i64: 128, 128>}, {pipeline_mode = #tpu.pipeline_mode<synchronous>, transform_indices = @transform_8, window_bounds = array<i64: 1, 128>}, {pipeline_mode = #tpu.pipeline_mode<synchronous>, transform_indices = @transform_9, window_bounds = array<i64: 128, 16>}, {pipeline_mode = #tpu.pipeline_mode<synchronous>, transform_indices = @transform_10, window_bounds = array<i64: 1, 16>}, {pipeline_mode = #tpu.pipeline_mode<synchronous>, transform_indices = @transform_11, window_bounds = array<i64: 8, 128>}, {pipeline_mode = #tpu.pipeline_mode<synchronous>, transform_indices = @transform_12, window_bounds = array<i64: 1, 128>}, {pipeline_mode = #tpu.pipeline_mode<synchronous>, transform_indices = @transform_13, window_bounds = array<i64: 128, 128>}, {pipeline_mode = #tpu.pipeline_mode<synchronous>, transform_indices = @transform_14, window_bounds = array<i64: 1, 128>}, {pipeline_mode = #tpu.pipeline_mode<synchronous>, transform_indices = @transform_15, window_bounds = array<i64: 128, 4>}, {pipeline_mode = #tpu.pipeline_mode<synchronous>, transform_indices = @transform_16, window_bounds = array<i64: 1, 4>}, {transform_indices = @transform_17, window_bounds = array<i64: 16, 20>}]} {
    %c0 = arith.constant 0 : index
    %c0_0 = arith.constant 0 : index
    %0 = vector.load %arg2[%c0, %c0_0] : memref<16x4xbf16, #tpu.memory_space<vmem>>, vector<16x4xbf16>
    %c0_1 = arith.constant 0 : index
    %c0_2 = arith.constant 0 : index
    %1 = vector.load %arg3[%c0_1, %c0_2] : memref<16x4xbf16, #tpu.memory_space<vmem>>, vector<16x4xbf16>
    %c0_3 = arith.constant 0 : index
    %c0_4 = arith.constant 0 : index
    %2 = vector.load %arg5[%c0_3, %c0_4] : memref<4x256xbf16, #tpu.memory_space<vmem>>, vector<4x256xbf16>
    %cst = arith.constant dense<0.000000e+00> : vector<16x256xf32>
    %3 = tpu.matmul %0, %2, %cst {dimension_numbers = #tpu.dot_dimension_numbers<[1], [0], [0], [1], [0, 0, 1, 1], [], []>} : vector<16x4xbf16>, vector<4x256xbf16>, vector<16x256xf32> -> vector<16x256xf32>
    %4 = vector.extract_strided_slice %3 {offsets = [0, 0], sizes = [16, 128], strides = [1, 1]} : vector<16x256xf32> to vector<16x128xf32>
    %c0_5 = arith.constant 0 : index
    %c0_6 = arith.constant 0 : index
    %5 = vector.load %arg6[%c0_5, %c0_6] : memref<4x128xbf16, #tpu.memory_space<vmem>>, vector<4x128xbf16>
    %cst_7 = arith.constant dense<0.000000e+00> : vector<16x128xf32>
    %6 = tpu.matmul %1, %5, %cst_7 {dimension_numbers = #tpu.dot_dimension_numbers<[1], [0], [0], [1], [0, 0, 1, 1], [], []>} : vector<16x4xbf16>, vector<4x128xbf16>, vector<16x128xf32> -> vector<16x128xf32>
    %7 = arith.addf %4, %6 : vector<16x128xf32>
    %c0_8 = arith.constant 0 : index
    %c0_9 = arith.constant 0 : index
    %8 = vector.load %arg7[%c0_8, %c0_9] : memref<1x128xf32, #tpu.memory_space<vmem>>, vector<1x128xf32>
    %9 = vector.broadcast %8 : vector<1x128xf32> to vector<16x128xf32>
    %10 = arith.addf %7, %9 : vector<16x128xf32>
    %cst_10 = arith.constant 0.000000e+00 : f32
    %11 = vector.broadcast %cst_10 : f32 to vector<16x128xf32>
    %12 = arith.maximumf %10, %11 : vector<16x128xf32>
    %13 = arith.truncf %12 : vector<16x128xf32> to vector<16x128xbf16>
    %c0_11 = arith.constant 0 : index
    %c0_12 = arith.constant 0 : index
    %14 = vector.load %arg8[%c0_11, %c0_12] : memref<128x128xbf16, #tpu.memory_space<vmem>>, vector<128x128xbf16>
    %cst_13 = arith.constant dense<0.000000e+00> : vector<16x128xf32>
    %15 = tpu.matmul %13, %14, %cst_13 {dimension_numbers = #tpu.dot_dimension_numbers<[1], [0], [0], [1], [0, 0, 1, 1], [], []>} : vector<16x128xbf16>, vector<128x128xbf16>, vector<16x128xf32> -> vector<16x128xf32>
    %c0_14 = arith.constant 0 : index
    %c0_15 = arith.constant 0 : index
    %16 = vector.load %arg9[%c0_14, %c0_15] : memref<1x128xf32, #tpu.memory_space<vmem>>, vector<1x128xf32>
    %17 = vector.broadcast %16 : vector<1x128xf32> to vector<16x128xf32>
    %18 = arith.addf %15, %17 : vector<16x128xf32>
    %cst_16 = arith.constant 0.000000e+00 : f32
    %19 = vector.broadcast %cst_16 : f32 to vector<16x128xf32>
    %20 = arith.maximumf %18, %19 : vector<16x128xf32>
    %21 = arith.truncf %20 : vector<16x128xf32> to vector<16x128xbf16>
    %c0_17 = arith.constant 0 : index
    %c0_18 = arith.constant 0 : index
    %22 = vector.load %arg10[%c0_17, %c0_18] : memref<128x16xbf16, #tpu.memory_space<vmem>>, vector<128x16xbf16>
    %cst_19 = arith.constant dense<0.000000e+00> : vector<16x16xf32>
    %23 = tpu.matmul %21, %22, %cst_19 {dimension_numbers = #tpu.dot_dimension_numbers<[1], [0], [0], [1], [0, 0, 1, 1], [], []>} : vector<16x128xbf16>, vector<128x16xbf16>, vector<16x16xf32> -> vector<16x16xf32>
    %c0_20 = arith.constant 0 : index
    %c0_21 = arith.constant 0 : index
    %24 = vector.load %arg11[%c0_20, %c0_21] : memref<1x16xf32, #tpu.memory_space<vmem>>, vector<1x16xf32>
    %25 = vector.broadcast %24 : vector<1x16xf32> to vector<16x16xf32>
    %26 = arith.addf %23, %25 : vector<16x16xf32>
    %27 = vector.extract_strided_slice %26 {offsets = [0, 0], sizes = [16, 8], strides = [1, 1]} : vector<16x16xf32> to vector<16x8xf32>
    %28 = vector.extract_strided_slice %26 {offsets = [0, 8], sizes = [16, 8], strides = [1, 1]} : vector<16x16xf32> to vector<16x8xf32>
    %cst_22 = arith.constant -4.000000e+00 : f32
    %cst_23 = arith.constant 1.500000e+01 : f32
    %29 = vector.broadcast %cst_22 : f32 to vector<16x8xf32>
    %30 = arith.maximumf %29, %28 : vector<16x8xf32>
    %31 = vector.broadcast %cst_23 : f32 to vector<16x8xf32>
    %32 = arith.minimumf %31, %30 : vector<16x8xf32>
    %33 = math.exp %32 : vector<16x8xf32>
    %c0_24 = arith.constant 0 : index
    %c0_25 = arith.constant 0 : index
    %34 = vector.load %arg4[%c0_24, %c0_25] : memref<16x8xf32, #tpu.memory_space<vmem>>, vector<16x8xf32>
    %35 = arith.mulf %33, %34 : vector<16x8xf32>
    %36 = arith.addf %27, %35 : vector<16x8xf32>
    %37 = vector.extract_strided_slice %3 {offsets = [0, 128], sizes = [16, 128], strides = [1, 1]} : vector<16x256xf32> to vector<16x128xf32>
    %38 = arith.truncf %36 : vector<16x8xf32> to vector<16x8xbf16>
    %c0_26 = arith.constant 0 : index
    %c0_27 = arith.constant 0 : index
    %39 = vector.load %arg12[%c0_26, %c0_27] : memref<8x128xbf16, #tpu.memory_space<vmem>>, vector<8x128xbf16>
    %cst_28 = arith.constant dense<0.000000e+00> : vector<16x128xf32>
    %40 = tpu.matmul %38, %39, %cst_28 {dimension_numbers = #tpu.dot_dimension_numbers<[1], [0], [0], [1], [0, 0, 1, 1], [], []>} : vector<16x8xbf16>, vector<8x128xbf16>, vector<16x128xf32> -> vector<16x128xf32>
    %41 = arith.addf %37, %40 : vector<16x128xf32>
    %c0_29 = arith.constant 0 : index
    %c0_30 = arith.constant 0 : index
    %42 = vector.load %arg13[%c0_29, %c0_30] : memref<1x128xf32, #tpu.memory_space<vmem>>, vector<1x128xf32>
    %43 = vector.broadcast %42 : vector<1x128xf32> to vector<16x128xf32>
    %44 = arith.addf %41, %43 : vector<16x128xf32>
    %cst_31 = arith.constant 0.000000e+00 : f32
    %45 = vector.broadcast %cst_31 : f32 to vector<16x128xf32>
    %46 = arith.maximumf %44, %45 : vector<16x128xf32>
    %47 = arith.truncf %46 : vector<16x128xf32> to vector<16x128xbf16>
    %c0_32 = arith.constant 0 : index
    %c0_33 = arith.constant 0 : index
    %48 = vector.load %arg14[%c0_32, %c0_33] : memref<128x128xbf16, #tpu.memory_space<vmem>>, vector<128x128xbf16>
    %cst_34 = arith.constant dense<0.000000e+00> : vector<16x128xf32>
    %49 = tpu.matmul %47, %48, %cst_34 {dimension_numbers = #tpu.dot_dimension_numbers<[1], [0], [0], [1], [0, 0, 1, 1], [], []>} : vector<16x128xbf16>, vector<128x128xbf16>, vector<16x128xf32> -> vector<16x128xf32>
    %c0_35 = arith.constant 0 : index
    %c0_36 = arith.constant 0 : index
    %50 = vector.load %arg15[%c0_35, %c0_36] : memref<1x128xf32, #tpu.memory_space<vmem>>, vector<1x128xf32>
    %51 = vector.broadcast %50 : vector<1x128xf32> to vector<16x128xf32>
    %52 = arith.addf %49, %51 : vector<16x128xf32>
    %cst_37 = arith.constant 0.000000e+00 : f32
    %53 = vector.broadcast %cst_37 : f32 to vector<16x128xf32>
    %54 = arith.maximumf %52, %53 : vector<16x128xf32>
    %c0_38 = arith.constant 0 : index
    %c0_39 = arith.constant 0 : index
    %55 = memref.load %arg1[%c0_38, %c0_39] : memref<1x1xf32, #tpu.memory_space<smem>>
    %56 = arith.truncf %54 : vector<16x128xf32> to vector<16x128xbf16>
    %c0_40 = arith.constant 0 : index
    %c0_41 = arith.constant 0 : index
    %57 = vector.load %arg16[%c0_40, %c0_41] : memref<128x4xbf16, #tpu.memory_space<vmem>>, vector<128x4xbf16>
    %cst_42 = arith.constant dense<0.000000e+00> : vector<16x4xf32>
    %58 = tpu.matmul %56, %57, %cst_42 {dimension_numbers = #tpu.dot_dimension_numbers<[1], [0], [0], [1], [0, 0, 1, 1], [], []>} : vector<16x128xbf16>, vector<128x4xbf16>, vector<16x4xf32> -> vector<16x4xf32>
    %c0_43 = arith.constant 0 : index
    %c0_44 = arith.constant 0 : index
    %59 = vector.load %arg17[%c0_43, %c0_44] : memref<1x4xf32, #tpu.memory_space<vmem>>, vector<1x4xf32>
    %60 = vector.broadcast %59 : vector<1x4xf32> to vector<16x4xf32>
    %61 = arith.addf %58, %60 : vector<16x4xf32>
    %62 = math.tanh %61 : vector<16x4xf32>
    %63 = vector.broadcast %55 : f32 to vector<16x4xf32>
    %64 = arith.mulf %63, %62 : vector<16x4xf32>
    %65 = tpu.concatenate %64, %27, %33 in 1 : vector<16x4xf32>, vector<16x8xf32>, vector<16x8xf32> -> vector<16x20xf32>
    %c0_45 = arith.constant 0 : index
    %c0_46 = arith.constant 0 : index
    %66 = vector.load %arg18[%c0_45, %c0_46] : memref<16x20xf32, #tpu.memory_space<vmem>>, vector<16x20xf32>
    tpu.vector_store %arg18[%c0_45, %c0_46], %65 {strides = array<i32>} : memref<16x20xf32, #tpu.memory_space<vmem>>, vector<16x20xf32>,
    return
  }
  func.func @transform_0(%arg0: i32) -> (i32, i32) {
    %c0_i32 = arith.constant 0 : i32
    %c0_i32_0 = arith.constant 0 : i32
    %c0_i32_1 = arith.constant 0 : i32
    return %c0_i32, %c0_i32_0 : i32, i32
  }
  func.func @transform_1(%arg0: i32) -> (i32, i32) {
    %c0_i32 = arith.constant 0 : i32
    %c0_i32_0 = arith.constant 0 : i32
    return %arg0, %c0_i32 : i32, i32
  }
  func.func @transform_2(%arg0: i32) -> (i32, i32) {
    %c0_i32 = arith.constant 0 : i32
    %c0_i32_0 = arith.constant 0 : i32
    return %arg0, %c0_i32 : i32, i32
  }
  func.func @transform_3(%arg0: i32) -> (i32, i32) {
    %c0_i32 = arith.constant 0 : i32
    %c0_i32_0 = arith.constant 0 : i32
    return %arg0, %c0_i32 : i32, i32
  }
  func.func @transform_4(%arg0: i32) -> (i32, i32) {
    %c0_i32 = arith.constant 0 : i32
    %c0_i32_0 = arith.constant 0 : i32
    %c0_i32_1 = arith.constant 0 : i32
    return %c0_i32, %c0_i32_0 : i32, i32
  }
  func.func @transform_5(%arg0: i32) -> (i32, i32) {
    %c0_i32 = arith.constant 0 : i32
    %c0_i32_0 = arith.constant 0 : i32
    %c0_i32_1 = arith.constant 0 : i32
    return %c0_i32, %c0_i32_0 : i32, i32
  }
  func.func @transform_6(%arg0: i32) -> (i32, i32) {
    %c0_i32 = arith.constant 0 : i32
    %c0_i32_0 = arith.constant 0 : i32
    %c0_i32_1 = arith.constant 0 : i32
    return %c0_i32, %c0_i32_0 : i32, i32
  }
  func.func @transform_7(%arg0: i32) -> (i32, i32) {
    %c0_i32 = arith.constant 0 : i32
    %c0_i32_0 = arith.constant 0 : i32
    %c0_i32_1 = arith.constant 0 : i32
    return %c0_i32, %c0_i32_0 : i32, i32
  }
  func.func @transform_8(%arg0: i32) -> (i32, i32) {
    %c0_i32 = arith.constant 0 : i32
    %c0_i32_0 = arith.constant 0 : i32
    %c0_i32_1 = arith.constant 0 : i32
    return %c0_i32, %c0_i32_0 : i32, i32
  }
  func.func @transform_9(%arg0: i32) -> (i32, i32) {
    %c0_i32 = arith.constant 0 : i32
    %c0_i32_0 = arith.constant 0 : i32
    %c0_i32_1 = arith.constant 0 : i32
    return %c0_i32, %c0_i32_0 : i32, i32
  }
  func.func @transform_10(%arg0: i32) -> (i32, i32) {
    %c0_i32 = arith.constant 0 : i32
    %c0_i32_0 = arith.constant 0 : i32
    %c0_i32_1 = arith.constant 0 : i32
    return %c0_i32, %c0_i32_0 : i32, i32
  }
  func.func @transform_11(%arg0: i32) -> (i32, i32) {
    %c0_i32 = arith.constant 0 : i32
    %c0_i32_0 = arith.constant 0 : i32
    %c0_i32_1 = arith.constant 0 : i32
    return %c0_i32, %c0_i32_0 : i32, i32
  }
  func.func @transform_12(%arg0: i32) -> (i32, i32) {
    %c0_i32 = arith.constant 0 : i32
    %c0_i32_0 = arith.constant 0 : i32
    %c0_i32_1 = arith.constant 0 : i32
    return %c0_i32, %c0_i32_0 : i32, i32
  }
  func.func @transform_13(%arg0: i32) -> (i32, i32) {
    %c0_i32 = arith.constant 0 : i32
    %c0_i32_0 = arith.constant 0 : i32
    %c0_i32_1 = arith.constant 0 : i32
    return %c0_i32, %c0_i32_0 : i32, i32
  }
  func.func @transform_14(%arg0: i32) -> (i32, i32) {
    %c0_i32 = arith.constant 0 : i32
    %c0_i32_0 = arith.constant 0 : i32
    %c0_i32_1 = arith.constant 0 : i32
    return %c0_i32, %c0_i32_0 : i32, i32
  }
  func.func @transform_15(%arg0: i32) -> (i32, i32) {
    %c0_i32 = arith.constant 0 : i32
    %c0_i32_0 = arith.constant 0 : i32
    %c0_i32_1 = arith.constant 0 : i32
    return %c0_i32, %c0_i32_0 : i32, i32
  }
  func.func @transform_16(%arg0: i32) -> (i32, i32) {
    %c0_i32 = arith.constant 0 : i32
    %c0_i32_0 = arith.constant 0 : i32
    %c0_i32_1 = arith.constant 0 : i32
    return %c0_i32, %c0_i32_0 : i32, i32
  }
  func.func @transform_17(%arg0: i32) -> (i32, i32) {
    %c0_i32 = arith.constant 0 : i32
    %c0_i32_0 = arith.constant 0 : i32
    return %arg0, %c0_i32 : i32, i32
  }
}

</mosaic_0001>

<bundles_post_ra>
// kernel: tpu_custom_call.1
= control target key start
LH: loop header
LB: loop body
LE: loop exit
PB: predicated region body
PF: predicated region fallthrough
CT: control target
= control target key end

     0   :  { %s1752_s27 = smov 0   ;;  %s1966_s0 = inlined_call_operand.<no memory space> [shape: f32[1,1], index: 0, kind: input, shape index: {}]   ;;  %s1967_s1 = inlined_call_operand.vmem [shape: bf16[32,4], index: 1, kind: input, shape index: {}]   ;;  %s1968_s2 = inlined_call_operand.vmem [shape: bf16[32,4], index: 2, kind: input, shape index: {}]   ;;  %s1969_s3 = inlined_call_operand.vmem [shape: f32[32,8], index: 3, kind: input, shape index: {}]   ;;  %s1970_s4 = inlined_call_operand.vmem [shape: bf16[4,256], index: 4, kind: input, shape index: {}]   ;;  %s1971_s5 = inlined_call_operand.vmem [shape: bf16[4,128], index: 5, kind: input, shape index: {}]   ;;  %s1972_s6 = inlined_call_operand.vmem [shape: f32[1,128], index: 6, kind: input, shape index: {}]   ;;  %s1973_s7 = inlined_call_operand.vmem [shape: bf16[128,128], index: 7, kind: input, shape index: {}]   ;;  %s1974_s8 = inlined_call_operand.vmem [shape: f32[1,128], index: 8, kind: input, shape index: {}]   ;;  %s1975_s9 = inlined_call_operand.vmem [shape: bf16[128,16], index: 9, kind: input, shape index: {}]   ;;  %s1976_s10 = inlined_call_operand.vmem [shape: f32[1,16], index: 10, kind: input, shape index: {}]   ;;  %s1977_s11 = inlined_call_operand.vmem [shape: bf16[8,128], index: 11, kind: input, shape index: {}]   ;;  %s1978_s12 = inlined_call_operand.vmem [shape: f32[1,128], index: 12, kind: input, shape index: {}]   ;;  %s1979_s13 = inlined_call_operand.vmem [shape: bf16[128,128], index: 13, kind: input, shape index: {}]   ;;  %s1980_s14 = inlined_call_operand.vmem [shape: f32[1,128], index: 14, kind: input, shape index: {}]   ;;  %s1981_s15 = inlined_call_operand.vmem [shape: bf16[128,4], index: 15, kind: input, shape index: {}]   ;;  %s1982_s16 = inlined_call_operand.vmem [shape: f32[1,4], index: 16, kind: input, shape index: {}]   ;;  %s1983_s17 = inlined_call_operand.vmem [shape: f32[32,20], index: 17, kind: output, shape index: {}]  }
   0x1   :  { %1984 = sst [smem:[#allocation3_spill]] %s1966_s0 }
   0x2   :  { %1985 = sst [smem:[#allocation4_spill]] %s1967_s1 }
   0x3   :  { %s1986_s26 = sld [smem:[#allocation3_spill]] }
   0x9   :  { %22 = sst [smem:[#allocation2]] %s1986_s26 }
   0xa LB: > { %s1397_s28 = sadd.s32 4294967295, %s1651_s27   ;;  %p1401_p0 = scmp.ge.s32.totalorder %s1651_s27, 1  ;;  %s1651_s27 = sphi %s1752_s27, %s28_s27  }
   0xb   : > { %p511_p1 = scmp.lt.s32.totalorder %s1651_s27, 3 }
   0xd   : > { %p512_p2 = pnand %p1401_p0, %p511_p1 }
   0xe   : > { %s1402_s19 = sshll.u32 (!%p512_p2), %s1397_s28, 1  ;;  %s1987_s22 = sld [smem:[#allocation4_spill]] (!%p512_p2) }
   0xf   : > { %515 = sbr.rel (%p512_p2) target bundleno = 1401 (0x579), region = 88  ;;  %p574_p3 = scmp.lt.s32.totalorder (!%p512_p2), %s1402_s19, 3 }
  0x10   : > { %s1657_s18 = smov (!%p512_p2), 4   ;;  %s1658_s24 = smov (!%p512_p2), 120  }
  0x14   : > { %v1411_v0 = vld.sshfl [vmem:[%s1970_s4] sm:$0x33 pattern:$0x76325410]  ;;  %vm621_vm0 = vcmask 1041408   ;;  %v1653_v2 = vmov 0.0  }
  0x15   : > { %v616_v1 = vcombine.high %v1411_v0, %v1411_v0  ;;  %1497 = vmatprep.subr.bf16.mxu1 %v1653_v2  ;;  %v623_v3 = vsel %vm621_vm0, %v1411_v0, 0  ;;  %v671_v4 = vld [vmem:[%s1971_s5] sm:$0x3]  ;;  %v1654_v6 = vmov 0   ;;  %vm1655_vm1 = vmmov 0   ;;  %s1989_s19 = smov (!%p574_p3, %s1402_s19), 3 }
  0x16   : > { %v681_v5 = vsel %vm621_vm0, %v671_v4, 0  ;;  %660 = vmatprep.mubr.bf16.mxu0 %v1654_v6  ;;  %1499 = vmatprep.mubr.msk.bf16.mxu1 %vm1655_vm1, %v1653_v2  ;;  %s1403_s1 = sshll.u32 %s1989_s19, 2  ;;  %vm617_vm2 = vcmask 31744   ;;  %v1605_v7 = vld [vmem:[%s1973_s7 + $0x38] sm:$0xff]   ;;  %v1606_v10 = vld [vmem:[%s1973_s7 + $0x30] sm:$0xff]   ;;  %v1607_v11 = vld [vmem:[%s1973_s7 + $0x28] sm:$0xff]  }
  0x17   : > { %1412 = vmatprep.subr.msk.bf16.mxu0 %vm621_vm0, %v616_v1  ;;  %1498 = vmatpush3.bf16.msra.mxu1 %v681_v5  ;;  %s577_s23 = scalar_lea.vmem %s1987_s22, %s1403_s1  ;;  %s583_s26 = scalar_lea.vmem %s1968_s2, %s1403_s1  ;;  %v1608_v12 = vld [vmem:[%s1973_s7 + $0x20] sm:$0xff]   ;;  %v1609_v13 = vld [vmem:[%s1973_s7 + $0x18] sm:$0xff]   ;;  %v1610_v14 = vld [vmem:[%s1973_s7 + $0x10] sm:$0xff]   ;;  %vm1001_vm3 = vcmask 1043456   ;;  %vm997_vm4 = vcmask 64512   ;;  %vm1311_vm5 = vcmask 97280  }
  0x18   : > { %643 = vmatpush1.bf16.msra.mxu0 %v623_v3  ;;  %1523 = vmatprep.subr.bf16.mxu1 %v1653_v2  ;;  %v1603_v8 = vld [vmem:[%s577_s23] sm:$0xff]   ;;  %v1611_v15 = vld [vmem:[%s1973_s7 + $0x8] sm:$0xff]   ;;  %v1613_v17 = vld [vmem:[%s1975_s9 + $0x38] sm:$0xff]   ;;  %s1407_s22 = sshll.u32 %s1989_s19, 3  ;;  %vm1314_vm6 = vcmask 162816  }
  0x19   : > { %1503 = vmatprep.subr.bf16.mxu0 %v1653_v2  ;;  %v1604_v9 = vld [vmem:[%s583_s26] sm:$0xff]   ;;  %v1614_v18 = vld [vmem:[%s1975_s9 + $0x30] sm:$0xff]   ;;  %v1615_v19 = vld [vmem:[%s1975_s9 + $0x28] sm:$0xff]   ;;  %s589_s25 = scalar_lea.vmem %s1969_s3, %s1407_s22  ;;  %s1656_s26 = smov 8  }
  0x1a   : > { %1500 = vmatmul.mubr.msk.bf16.vlgmr.msra.gmra.mxu1 %vm617_vm2, %v1604_v9  ;;  %v1612_v16 = vld [vmem:[%s1973_s7] sm:$0xff]   ;;  %v1617_v21 = vld [vmem:[%s1975_s9 + $0x18] sm:$0xff]   ;;  %v1618_v37 = vld [vmem:[%s1975_s9 + $0x10] sm:$0xff]   ;;  %s595_s29 = scalar_lea.vmem %s1983_s17, %s1407_s22 }
  0x1b   : > { %1413 = vmatmul.mubr.msk.bf16.vlgmr.msra.gmra.mxu0 %vm617_vm2, %v1603_v8  ;;  %1539 = vmatprep.mubr.msk.bf16.mxu1 %vm1655_vm1, %v1653_v2  ;;  %v1616_v20 = vld [vmem:[%s1975_s9 + $0x20] sm:$0xff]   ;;  %v1619_v38 = vld [vmem:[%s1975_s9 + $0x8] sm:$0xff]   ;;  %v1621_v8 = vld [vmem:[%s1979_s13 + $0x38] sm:$0xff]  }
  0x1c   : > { %1504 = vmatpush3.bf16.msra.mxu0 %v1605_v7  ;;  %1519 = vmatprep.mubr.msk.bf16.mxu0 %vm1655_vm1, %v1653_v2  ;;  %v1416_v26 = vld [vmem:[%s1972_s6] ss:$0 sm:$0xff]  ;;  %v974_v41 = vld [vmem:[%s589_s25 + $0x8] sm:$0xff] }
  0x1d   : > { %1505 = vmatprep.subr.bf16.mxu0 %v1653_v2  ;;  %1524 = vmatpush3.bf16.msra.mxu1 %v1613_v17  ;;  %v1620_v39 = vld [vmem:[%s1975_s9] sm:$0xff]  }
  0x1e   : > { %1525 = vmatprep.subr.bf16.mxu1 %v1653_v2  ;;  %v973_v40 = vld [vmem:[%s589_s25] sm:$0xff]  ;;  %s1174_s25 = sld [smem:[#allocation2]] }
  0x1f   : > { %977 = vrot.lane.b32.xlu0 %v973_v40, %s1656_s26  ;;  %v1417_v43 = vld [vmem:[%s1974_s8] ss:$0 sm:$0xff] }
  0x20   : > { %1506 = vmatpush3.bf16.msra.mxu0 %v1606_v10  ;;  %v1426_v53 = vld [vmem:[%s1976_s10] ss:$0 sm:$0xff]  ;;  %v1622_v10 = vld [vmem:[%s1979_s13 + $0x30] sm:$0xff]  }
  0x21   : > { %1507 = vmatprep.subr.bf16.mxu0 %v1653_v2  ;;  %1526 = vmatpush3.bf16.msra.mxu1 %v1614_v18  ;;  %v996_v3 = vld [vmem:[%s1977_s11] sm:$0xf] }
  0x22   : > { %1527 = vmatprep.subr.bf16.mxu1 %v1653_v2  ;;  %v1003_v4 = vsel %vm1001_vm3, %v996_v3, 0 }
  0x23   : > { %979 = vrot.lane.b32.xlu0 %v974_v41, %s1656_s26 }
  0x24   : > { %1508 = vmatpush3.bf16.msra.mxu0 %v1607_v11 }
  0x25   : > { %1509 = vmatprep.subr.bf16.mxu0 %v1653_v2  ;;  %1528 = vmatpush3.bf16.msra.mxu1 %v1615_v19 }
  0x26   : > { %1529 = vmatprep.subr.bf16.mxu1 %v1653_v2 }
  0x28   : > { %1510 = vmatpush3.bf16.msra.mxu0 %v1608_v12 }
  0x29   : > { %1511 = vmatprep.subr.bf16.mxu0 %v1653_v2  ;;  %1530 = vmatpush3.bf16.msra.mxu1 %v1616_v20 }
  0x2a   : > { %1531 = vmatprep.subr.bf16.mxu1 %v1653_v2 }
  0x2c   : > { %1512 = vmatpush3.bf16.msra.mxu0 %v1609_v13  ;;  %v1623_v13 = vld [vmem:[%s1979_s13 + $0x28] sm:$0xff]  }
  0x2d   : > { %1513 = vmatprep.subr.bf16.mxu0 %v1653_v2  ;;  %1532 = vmatpush3.bf16.msra.mxu1 %v1617_v21  ;;  %v1626_v21 = vld [vmem:[%s1979_s13 + $0x10] sm:$0xff]  }
  0x2e   : > { %1533 = vmatprep.subr.bf16.mxu1 %v1653_v2 }
  0x30   : > { %1514 = vmatpush3.bf16.msra.mxu0 %v1610_v14  ;;  %v1624_v14 = vld [vmem:[%s1979_s13 + $0x20] sm:$0xff]  }
  0x31   : > { %1515 = vmatprep.subr.bf16.mxu0 %v1653_v2  ;;  %1534 = vmatpush3.bf16.msra.mxu1 %v1618_v37 }
  0x32   : > { %1535 = vmatprep.subr.bf16.mxu1 %v1653_v2 }
  0x34   : > { %1516 = vmatpush3.bf16.msra.mxu0 %v1611_v15  ;;  %v1625_v15 = vld [vmem:[%s1979_s13 + $0x18] sm:$0xff]  }
  0x35   : > { %1517 = vmatprep.subr.bf16.mxu0 %v1653_v2  ;;  %1536 = vmatpush3.bf16.msra.mxu1 %v1619_v38 }
  0x36   : > { %1537 = vmatprep.subr.bf16.mxu1 %v1653_v2 }
  0x38   : > { %1518 = vmatpush3.bf16.msra.mxu0 %v1612_v16 }
  0x39   : > { %1543 = vmatprep.subr.bf16.mxu0 %v1653_v2  ;;  %1538 = vmatpush3.bf16.msra.mxu1 %v1620_v39 }
  0x3a   : > { %1549 = vmatprep.subr.bf16.mxu1 %v1653_v2 }
  0x91   : > { %v978_v5 = vpop.permute.xlu0 %977 }
  0x95   : > { %v980_v9 = vpop.permute.xlu0 %979 }
  0xda   : > { %v717_v23 = vpop.f32.mrf.mxu1 }
  0xdb   : > { %v662_v22 = vpop.f32.mrf.mxu0 }
  0xdc   : > { %v724_v24 = vadd.f32 %v717_v23, %v662_v22  ;;  %v1501_v27 = vpop.f32.mrf.mxu1  ;;  %v1627_v22 = vld [vmem:[%s1979_s13 + $0x8] sm:$0xff]   ;;  %v1628_v23 = vld [vmem:[%s1979_s13] sm:$0xff]  }
  0xdd   : > { %v1838_v25 = vpop.f32.mrf.mxu0  ;;  %v1631_v27 = vld [vmem:[%s1981_s15 + $0x28] sm:$0xff]  }
  0xde   : > { %v720_v29 = vpop.f32.mrf.mxu1  ;;  %v733_v30 = vadd.f32 %v1416_v26, %v724_v24  ;;  %v1629_v24 = vld [vmem:[%s1981_s15 + $0x38] sm:$0xff]  }
  0xdf   : > { %v666_v28 = vpop.f32.mrf.mxu0 }
  0xe0   : > { %v725_v31 = vadd.f32 %v720_v29, %v666_v28  ;;  %v1502_v32 = vpop.f32.mrf.mxu1  ;;  %v735_v34 = vmax.f32 %v733_v30, 0.0  ;;  %v1632_v28 = vld [vmem:[%s1981_s15 + $0x20] sm:$0xff]   ;;  %v1633_v29 = vld [vmem:[%s1981_s15 + $0x18] sm:$0xff]  }
  0xe1   : > { %v1863_v42 = vpop.f32.mrf.mxu0  ;;  %v1436_v32 = vld [vmem:[%s1978_s12] ss:$0 sm:$0xff] }
  0xe2   : > { %v734_v33 = vadd.f32 %v1416_v26, %v725_v31  ;;  %v1630_v26 = vld [vmem:[%s1981_s15 + $0x30] sm:$0xff]  }
  0xe4   : > { %v736_v35 = vmax.f32 %v734_v33, 0.0 }
  0xe6   : > { %v737_v36 = vpack.c.bf16 %v736_v35, %v735_v34 }
  0xe8   : > { %1520 = vmatmul.mubr.bf16.vlgmr.msra.gmra.mxu0 %v737_v36 }
  0xe9   : > { %1545 = vmatprep.mubr.msk.bf16.mxu0 %vm1655_vm1, %v1653_v2  ;;  %1544 = vmatpush3.bf16.msra.mxu0 %v1003_v4 }
  0xea   : > { %1569 = vmatprep.subr.bf16.mxu0 %v1653_v2 }
 0x1a8   : > { %v843_v44 = vpop.f32.mrf.mxu0 }
 0x1a9   : > { %v844_v46 = vadd.f32 %v1417_v43, %v843_v44  ;;  %v1437_v44 = vld [vmem:[%s1980_s14] ss:$0 sm:$0xff] }
 0x1aa   : > { %v1521_v45 = vpop.f32.mrf.mxu0 }
 0x1ab   : > { %v850_v50 = vmax.f32 %v844_v46, 0.0 }
 0x1ac   : > { %v846_v47 = vpop.f32.mrf.mxu0 }
 0x1ad   : > { %v847_v48 = vadd.f32 %v1417_v43, %v846_v47  ;;  %v1634_v43 = vld [vmem:[%s1981_s15 + $0x10] sm:$0xff]  }
 0x1ae   : > { %v1522_v49 = vpop.f32.mrf.mxu0 }
 0x1af   : > { %v851_v51 = vmax.f32 %v847_v48, 0.0 }
 0x1b1   : > { %v852_v52 = vpack.c.bf16 %v851_v51, %v850_v50 }
 0x1b3   : > { %1540 = vmatmul.mubr.bf16.vlgmr.msra.gmra.mxu1 %v852_v52 }
 0x1b4   : > { %1565 = vmatprep.mubr.msk.bf16.mxu1 %vm1655_vm1, %v1653_v2  ;;  %1550 = vmatpush3.bf16.msra.mxu1 %v1621_v8 }
 0x1b5   : > { %1551 = vmatprep.subr.bf16.mxu1 %v1653_v2 }
 0x1b8   : > { %1552 = vmatpush3.bf16.msra.mxu1 %v1622_v10 }
 0x1b9   : > { %1553 = vmatprep.subr.bf16.mxu1 %v1653_v2 }
 0x1bc   : > { %1554 = vmatpush3.bf16.msra.mxu1 %v1623_v13 }
 0x1bd   : > { %1555 = vmatprep.subr.bf16.mxu1 %v1653_v2 }
 0x1c0   : > { %1556 = vmatpush3.bf16.msra.mxu1 %v1624_v14 }
 0x1c1   : > { %1557 = vmatprep.subr.bf16.mxu1 %v1653_v2 }
 0x1c4   : > { %1558 = vmatpush3.bf16.msra.mxu1 %v1625_v15 }
 0x1c5   : > { %1559 = vmatprep.subr.bf16.mxu1 %v1653_v2 }
 0x1c8   : > { %1560 = vmatpush3.bf16.msra.mxu1 %v1626_v21 }
 0x1c9   : > { %1561 = vmatprep.subr.bf16.mxu1 %v1653_v2 }
 0x1cc   : > { %1562 = vmatpush3.bf16.msra.mxu1 %v1627_v22 }
 0x1cd   : > { %1563 = vmatprep.subr.bf16.mxu1 %v1653_v2 }
 0x1d0   : > { %1564 = vmatpush3.bf16.msra.mxu1 %v1628_v23 }
 0x273   : > { %v958_v54 = vpop.f32.mrf.mxu1 }
 0x274   : > { %v959_v55 = vadd.f32 %v1426_v53, %v958_v54 }
 0x275   : > { %v1541_v56 = vpop.f32.mrf.mxu1 }
 0x276   : > { %v965_v57 = vmax.f32 %v959_v55, -4.0  ;;  %1295 = vrot.lane.b32.xlu0 %v959_v55, %s1657_s18 }
 0x277   : > { %v961_v58 = vpop.f32.mrf.mxu1 }
 0x278   : > { %v967_v59 = vmin.f32 %v965_v57, 15.0  ;;  %v962_v60 = vadd.f32 %v1426_v53, %v961_v58 }
 0x279   : > { %v1542_v61 = vpop.f32.mrf.mxu1 }
 0x27a   : > { %v969_v62 = vmul.f32 1.442695, %v967_v59  ;;  %v966_v63 = vmax.f32 %v962_v60, -4.0 }
 0x27c   : > { %1637 = vpow2.f32 %v969_v62  ;;  %v968_v0 = vmin.f32 %v966_v63, 15.0 }
 0x27e   : > { %v971_v1 = vmul.f32 1.442695, %v968_v0 }
 0x280   : > { %1639 = vpow2.f32 %v971_v1 }
 0x289   : > { %v1638_v6 = vpop.eup %1637 }
 0x28a   : > { %v983_v7 = vmul.f32 %v1638_v6, %v978_v5  ;;  %1303 = vrot.lane.b32.xlu0 %v1638_v6, %s1657_s18 }
 0x28c   : > { %987 = vrot.lane.b32.xlu1 %v983_v7, %s1658_s24 }
 0x28d   : > { %v1640_v11 = vpop.eup %1639 }
 0x28e   : > { %v984_v12 = vmul.f32 %v1640_v11, %v980_v9 }
 0x290   : > { %989 = vrot.lane.b32.xlu1 %v984_v12, %s1658_s24 }
 0x294   : > { %1297 = vrot.lane.b32.xlu1 %v962_v60, %s1657_s18 }
 0x298   : > { %1305 = vrot.lane.b32.xlu1 %v1640_v11, %s1657_s18 }
 0x2e8   : > { %v1296_v61 = vpop.permute.xlu0 %1295 }
 0x2fc   : > { %v1304_v1 = vpop.permute.xlu0 %1303 }
 0x2fe   : > { %v988_v16 = vpop.permute.xlu1 %987 }
 0x2ff   : > { %v993_v18 = vadd.f32 %v988_v16, %v959_v55 }
 0x302   : > { %v990_v17 = vpop.permute.xlu1 %989 }
 0x303   : > { %v994_v19 = vadd.f32 %v990_v17, %v962_v60  ;;  %v1290_v60 = vstv %s1174_s25 }
 0x305   : > { %v995_v20 = vpack.c.bf16 %v994_v19, %v993_v18 }
 0x306   : > { %v1298_v63 = vpop.permute.xlu1 %1297 }
 0x307   : > { %1546 = vmatmul.mubr.msk.bf16.vlgmr.msra.gmra.mxu0 %vm997_vm4, %v995_v20 }
 0x308   : > { %1585 = vmatprep.mubr.msk.bf16.mxu0 %vm1655_vm1, %v1653_v2  ;;  %1570 = vmatpush3.bf16.msra.mxu0 %v1629_v24 }
 0x309   : > { %1571 = vmatprep.subr.bf16.mxu0 %v1653_v2 }
 0x30a   : > { %v1306_v7 = vpop.permute.xlu1 %1305 }
 0x30c   : > { %1572 = vmatpush3.bf16.msra.mxu0 %v1630_v26 }
 0x30d   : > { %1573 = vmatprep.subr.bf16.mxu0 %v1653_v2 }
 0x310   : > { %1574 = vmatpush3.bf16.msra.mxu0 %v1631_v27 }
 0x311   : > { %1575 = vmatprep.subr.bf16.mxu0 %v1653_v2 }
 0x314   : > { %1576 = vmatpush3.bf16.msra.mxu0 %v1632_v28 }
 0x315   : > { %1577 = vmatprep.subr.bf16.mxu0 %v1653_v2 }
 0x318   : > { %1578 = vmatpush3.bf16.msra.mxu0 %v1633_v29 }
 0x319   : > { %1579 = vmatprep.subr.bf16.mxu0 %v1653_v2 }
 0x31c   : > { %1580 = vmatpush3.bf16.msra.mxu0 %v1634_v43 }
 0x31d   : > { %1581 = vmatprep.subr.bf16.mxu0 %v1653_v2 }
 0x3c7   : > { %v1039_v30 = vpop.f32.mrf.mxu0 }
 0x3c8   : > { %v1046_v31 = vadd.f32 %v1039_v30, %v1838_v25  ;;  %v1635_v25 = vld [vmem:[%s1981_s15 + $0x8] sm:$0xff]  }
 0x3c9   : > { %v1547_v33 = vpop.f32.mrf.mxu0  ;;  %1582 = vmatpush3.bf16.msra.mxu0 %v1635_v25 }
 0x3ca   : > { %v1055_v35 = vadd.f32 %v1436_v32, %v1046_v31  ;;  %1583 = vmatprep.subr.bf16.mxu0 %v1653_v2  ;;  %v1446_v2 = vld [vmem:[%s1982_s16] ss:$0 sm:$0xff] }
 0x3cb   : > { %v1042_v34 = vpop.f32.mrf.mxu0 }
 0x3cc   : > { %v1047_v36 = vadd.f32 %v1042_v34, %v1863_v42  ;;  %v1057_v39 = vmax.f32 %v1055_v35, 0.0  ;;  %v1636_v42 = vld [vmem:[%s1981_s15] sm:$0xff]  }
 0x3cd   : > { %v1548_v37 = vpop.f32.mrf.mxu0  ;;  %1584 = vmatpush3.bf16.msra.mxu0 %v1636_v42 }
 0x3ce   : > { %v1056_v38 = vadd.f32 %v1436_v32, %v1047_v36 }
 0x3d0   : > { %v1058_v40 = vmax.f32 %v1056_v38, 0.0 }
 0x3d2   : > { %v1059_v41 = vpack.c.bf16 %v1058_v40, %v1057_v39 }
 0x3d4   : > { %1566 = vmatmul.mubr.bf16.vlgmr.msra.gmra.mxu1 %v1059_v41 }
 0x494   : > { %v1165_v45 = vpop.f32.mrf.mxu1 }
 0x495   : > { %v1166_v47 = vadd.f32 %v1437_v44, %v1165_v45 }
 0x496   : > { %v1567_v46 = vpop.f32.mrf.mxu1 }
 0x497   : > { %v1172_v51 = vmax.f32 %v1166_v47, 0.0 }
 0x498   : > { %v1168_v48 = vpop.f32.mrf.mxu1 }
 0x499   : > { %v1169_v49 = vadd.f32 %v1437_v44, %v1168_v48 }
 0x49a   : > { %v1568_v50 = vpop.f32.mrf.mxu1 }
 0x49b   : > { %v1173_v52 = vmax.f32 %v1169_v49, 0.0 }
 0x49d   : > { %v1175_v53 = vpack.c.bf16 %v1173_v52, %v1172_v51 }
 0x49f   : > { %1586 = vmatmul.mubr.bf16.vlgmr.msra.gmra.mxu0 %v1175_v53 }
 0x55f   : > { %v1281_v54 = vpop.f32.mrf.mxu0 }
 0x560   : > { %v1282_v55 = vadd.f32 %v1446_v2, %v1281_v54 }
 0x561   : > { %v1587_v56 = vpop.f32.mrf.mxu0 }
 0x562   : > { %1641 = vtanh.f32 %v1282_v55 }
 0x563   : > { %v1284_v57 = vpop.f32.mrf.mxu0 }
 0x564   : > { %v1285_v58 = vadd.f32 %v1446_v2, %v1284_v57 }
 0x565   : > { %v1588_v59 = vpop.f32.mrf.mxu0 }
 0x566   : > { %1643 = vtanh.f32 %v1285_v58 }
 0x56f   : > { %v1642_v62 = vpop.eup %1641 }
 0x570   : > { %v1291_v0 = vmul.f32 %v1642_v62, %v1290_v60 }
 0x572   : > { %v1309_v3 = vsel %vm617_vm2, %v1291_v0, %v1296_v61 }
 0x573   : > { %v1644_v4 = vpop.eup %1643  ;;  %v1312_v5 = vsel %vm1311_vm5, %v1309_v3, %v1304_v1 }
 0x574   : > { %1315 = vst.msk [vmem:[%s595_s29] sm:$0xff] %vm1314_vm6, %v1312_v5  ;;  %v1292_v6 = vmul.f32 %v1644_v4, %v1290_v60 }
 0x576   : > { %v1310_v8 = vsel %vm617_vm2, %v1292_v6, %v1298_v63 }
 0x577   : > { %v1313_v9 = vsel %vm1311_vm5, %v1310_v8, %v1306_v7 }
 0x578   : > { %1316 = vst.msk [vmem:[%s595_s29 + $0x8] sm:$0xff] %vm1314_vm6, %v1313_v9 }
 0x579 PF: > { %s28_s27 = sadd.s32 1, %s1651_s27  }
 0x57a   : > { %p25_p4 = scmp.ge.s32.totalorder %s28_s27, 4  }
 0x57c   :  { %27 = sbr.rel (!%p25_p4) target bundleno = 10 (0xa), region = 124 }

</bundles_post_ra>
